<compile_context>
chip_gen: v7x
topology: tpu7x:2x2x1
jax: 0.10.0
libtpu: 0.0.40
codegen_flags: <defaults>
</compile_context>

<pallas_src>
import functools

import jax
import jax.numpy as jnp
from jax.experimental import pallas as pl
from jax.experimental.pallas import tpu as pltpu

# Channel sizes fixed by the module definition.
C_IN, C1, C2, C3, C4, C_OUT = 384, 256, 128, 64, 32, 26
CP = 128          # final-layer channels zero-padded to a full lane width
BN_EPS = 1e-5


# ---------------------------------------------------------------------------
# Fused kernel: 1x1-conv chain (matmul+bias+ReLU x4, matmul+bias) + bilinear 2x
# ---------------------------------------------------------------------------
def seg_head_fused_kernel(x_ref, w1, b1, w2, b2, w3, b3, w4, b4, w5, b5, up_ref,
                          o_ref, *, images_per_tile, hw, compute_dtype):
    f32 = jnp.float32
    h = x_ref[...]                                                   # (ipt*HW, 384)
    h = jnp.maximum(jnp.dot(h, w1[...], preferred_element_type=f32) + b1[...], 0.0).astype(compute_dtype)
    h = jnp.maximum(jnp.dot(h, w2[...], preferred_element_type=f32) + b2[...], 0.0).astype(compute_dtype)
    h = jnp.maximum(jnp.dot(h, w3[...], preferred_element_type=f32) + b3[...], 0.0).astype(compute_dtype)
    h = jnp.maximum(jnp.dot(h, w4[...], preferred_element_type=f32) + b4[...], 0.0).astype(compute_dtype)
    y = jnp.dot(h, w5[...], preferred_element_type=f32) + b5[...]    # (ipt*HW, CP) f32

    up = up_ref[...]                                                 # (4*HW, HW) f32
    ohw = 4 * hw
    for img in range(images_per_tile):                               # static unroll (small)
        y_img = y[img * hw:(img + 1) * hw, :]                        # (HW, CP)
        o_ref[img * ohw:(img + 1) * ohw, :] = jnp.dot(
            up, y_img, preferred_element_type=f32)                   # (4*HW, CP)


# ---------------------------------------------------------------------------
# Bilinear align_corners=True interpolation matrices
# ---------------------------------------------------------------------------
def interp_matrix(n_in, n_out):
    """Row-interpolation matrix for align_corners=True bilinear resampling."""
    src = jnp.arange(n_out, dtype=jnp.float32) * (n_in - 1) / max(n_out - 1, 1)
    i0 = jnp.clip(jnp.floor(src).astype(jnp.int32), 0, n_in - 1)
    i1 = jnp.clip(i0 + 1, 0, n_in - 1)
    frac = src - i0.astype(jnp.float32)
    A = jnp.zeros((n_out, n_in), jnp.float32)
    A = A.at[jnp.arange(n_out), i0].add(1.0 - frac)
    A = A.at[jnp.arange(n_out), i1].add(frac)
    return A


# ---------------------------------------------------------------------------
# Wrapper
# ---------------------------------------------------------------------------
def seg_head_forward(x_nchw, params, *, tile_m=1024, compute_dtype=jnp.bfloat16):
    """x_nchw: (N, 384, H, W) f32 -> (N, 26, 2H, 2W) f32.

    compute_dtype=jnp.bfloat16 for v6e/v7x (bf16 MXU, f32 accumulation);
    use jnp.float32 on v5e.
    """
    N, Cin, H, W = x_nchw.shape
    assert Cin == C_IN
    HW, OHW = H * W, 4 * H * W

    # Boundary transpose only (PyTorch NCHW -> NHWC so channels sit in lanes).
    x_flat = jnp.transpose(x_nchw, (0, 2, 3, 1)).reshape(N * HW, C_IN).astype(compute_dtype)

    # Tile = integer number of images; keep >=2 grid steps when possible (megacore).
    ipt = max(1, tile_m // HW)
    if N >= 2:
        ipt = min(ipt, pl.cdiv(N, 2))
    n_tiles = pl.cdiv(N, ipt)
    N_pad = n_tiles * ipt
    if N_pad != N:
        x_flat = jnp.pad(x_flat, ((0, (N_pad - N) * HW), (0, 0)))

    # Weights -> compute dtype; final layer zero-padded to CP lanes; biases f32.
    wbs = []
    for li, (w, b) in enumerate(params):
        if li == 4:
            w = jnp.pad(w, ((0, 0), (0, CP - C_OUT)))
            b = jnp.pad(b, ((0, 0), (0, CP - C_OUT)))
        wbs.extend([w.astype(compute_dtype), b.astype(jnp.float32)])

    # 2x bilinear (align_corners=True) as one matrix: kron(Ah, Aw) of shape (4HW, HW).
    # TODO(synk): for very large H*W, switch to the separable (Ah, Aw) two-step
    # form and sub-image tiling to avoid the (4HW, HW) matrix / VMEM blowup.
    up = jnp.kron(interp_matrix(H, 2 * H), interp_matrix(W, 2 * W))

    tile_rows_in, tile_rows_out = ipt * HW, ipt * OHW

    in_specs = [pl.BlockSpec((tile_rows_in, C_IN), lambda i: (i, 0))]
    for arr in wbs:
        in_specs.append(pl.BlockSpec(arr.shape, lambda i: (0, 0)))
    in_specs.append(pl.BlockSpec(up.shape, lambda i: (0, 0)))
    out_spec = pl.BlockSpec((tile_rows_out, CP), lambda i: (i, 0))

    dims = [C_IN, C1, C2, C3, C4, CP]
    mm_flops = 2 * N_pad * HW * sum(dims[i] * dims[i + 1] for i in range(5))
    up_flops = 2 * N_pad * OHW * HW * CP
    bytes_accessed = (x_flat.size * x_flat.dtype.itemsize
                      + N_pad * OHW * CP * 4
                      + sum(a.size * a.dtype.itemsize for a in wbs)
                      + up.size * 4)
    cost = pl.CostEstimate(flops=int(mm_flops + up_flops), transcendentals=0,
                           bytes_accessed=int(bytes_accessed))

    kernel = functools.partial(seg_head_fused_kernel, images_per_tile=ipt,
                               hw=HW, compute_dtype=compute_dtype)

    y = pl.pallas_call(
        kernel,
        out_shape=jax.ShapeDtypeStruct((N_pad * OHW, CP), jnp.float32),
        grid_spec=pltpu.PrefetchScalarGridSpec(
            num_scalar_prefetch=0,
            grid=(n_tiles,),
            in_specs=in_specs,
            out_specs=out_spec,
        ),
        compiler_params=pltpu.CompilerParams(
            dimension_semantics=("parallel",),
            vmem_limit_bytes=48 * 1024 * 1024,
        ),
        cost_estimate=cost,
    )(x_flat, *wbs, up)

    y = y.reshape(N_pad, 2 * H, 2 * W, CP)[:N, :, :, :C_OUT]
    return jnp.transpose(y, (0, 3, 1, 2))  # back to NCHW to match PyTorch


# ---------------------------------------------------------------------------
# Parameter construction (deterministic, eval-mode BatchNorm folded into conv)
# ---------------------------------------------------------------------------
def make_params(key):
    dims = [C_IN, C1, C2, C3, C4, C_OUT]
    params = []
    for layer in range(5):
        cin, cout = dims[layer], dims[layer + 1]
        key, kw, kb, kg, kbe, km, kv = jax.random.split(key, 7)
        w = jax.random.normal(kw, (cin, cout), jnp.float32) * 0.05
        b = jax.random.normal(kb, (cout,), jnp.float32) * 0.05
        if layer < 4:
            # BatchNorm2d in eval mode: y = gamma*(x - mean)/sqrt(var+eps) + beta
            gamma = 0.5 + jax.random.uniform(kg, (cout,), jnp.float32)
            beta = jax.random.normal(kbe, (cout,), jnp.float32) * 0.05
            mean = jax.random.normal(km, (cout,), jnp.float32) * 0.05
            var = 0.5 + jax.random.uniform(kv, (cout,), jnp.float32)
            scale = gamma / jnp.sqrt(var + BN_EPS)
            w = w * scale[None, :]
            b = (b - mean) * scale + beta
        params.append((w, b.reshape(1, cout)))
    # TODO(synk): Dropout layers are identity in eval mode and therefore omitted.
    return params


# ---------------------------------------------------------------------------
# Pure-JAX f32 reference (for a loose correctness check against bf16 kernel)
# ---------------------------------------------------------------------------
def seg_head_reference(x_nchw, params):
    N, C, H, W = x_nchw.shape
    h = jnp.transpose(x_nchw, (0, 2, 3, 1)).reshape(-1, C)
    for li, (w, b) in enumerate(params):
        h = h @ w + b
        if li < 4:
            h = jnp.maximum(h, 0.0)
    y = h.reshape(N, H, W, C_OUT)
    Ah, Aw = interp_matrix(H, 2 * H), interp_matrix(W, 2 * W)
    y = jnp.einsum("oh,nhwc->nowc", Ah, y)
    y = jnp.einsum("pw,nowc->nopc", Aw, y)
    return jnp.transpose(y, (0, 3, 1, 2))


if __name__ == "__main__":
    key = jax.random.PRNGKey(0)
    k_x, k_p = jax.random.split(key)
    # Small spatial size, but channels are fixed by the module (384 in).
    N, H, W = 2, 8, 8
    x = jax.random.normal(k_x, (N, C_IN, H, W), jnp.float32)
    params = make_params(k_p)

    out = jax.block_until_ready(seg_head_forward(x, params))
    assert out.shape == (N, C_OUT, 2 * H, 2 * W), out.shape
    assert out.dtype == jnp.float32

    ref = jax.block_until_ready(seg_head_reference(x, params))
    err = float(jnp.max(jnp.abs(out - ref)))
    tol = 0.05 * (float(jnp.max(jnp.abs(ref))) + 1.0)   # loose: bf16 through 5 matmuls
    assert err <= tol, (err, tol)
    print("KERNEL_OK")
</pallas_src>

<mosaic_0001>
module attributes {stable_mosaic.version = 11 : i64} {
  func.func @seg_head_fused_kernel(%arg0: i32, %arg1: memref<64x384xbf16, #tpu.memory_space<vmem>>, %arg2: memref<384x256xbf16, #tpu.memory_space<vmem>>, %arg3: memref<1x256xf32, #tpu.memory_space<vmem>>, %arg4: memref<256x128xbf16, #tpu.memory_space<vmem>>, %arg5: memref<1x128xf32, #tpu.memory_space<vmem>>, %arg6: memref<128x64xbf16, #tpu.memory_space<vmem>>, %arg7: memref<1x64xf32, #tpu.memory_space<vmem>>, %arg8: memref<64x32xbf16, #tpu.memory_space<vmem>>, %arg9: memref<1x32xf32, #tpu.memory_space<vmem>>, %arg10: memref<32x128xbf16, #tpu.memory_space<vmem>>, %arg11: memref<1x128xf32, #tpu.memory_space<vmem>>, %arg12: memref<256x64xf32, #tpu.memory_space<vmem>>, %arg13: memref<256x128xf32, #tpu.memory_space<vmem>>) attributes {dimension_semantics = [#tpu.dimension_semantics<parallel>], iteration_bounds = array<i64: 2>, scalar_prefetch = 0 : i64, scratch_operands = 0 : i64, tpu.core_type = #tpu.core_type<tc>, window_params = [{transform_indices = @transform_0, window_bounds = array<i64: 64, 384>}, {pipeline_mode = #tpu.pipeline_mode<synchronous>, transform_indices = @transform_1, window_bounds = array<i64: 384, 256>}, {pipeline_mode = #tpu.pipeline_mode<synchronous>, transform_indices = @transform_2, window_bounds = array<i64: 1, 256>}, {pipeline_mode = #tpu.pipeline_mode<synchronous>, transform_indices = @transform_3, window_bounds = array<i64: 256, 128>}, {pipeline_mode = #tpu.pipeline_mode<synchronous>, transform_indices = @transform_4, window_bounds = array<i64: 1, 128>}, {pipeline_mode = #tpu.pipeline_mode<synchronous>, transform_indices = @transform_5, window_bounds = array<i64: 128, 64>}, {pipeline_mode = #tpu.pipeline_mode<synchronous>, transform_indices = @transform_6, window_bounds = array<i64: 1, 64>}, {pipeline_mode = #tpu.pipeline_mode<synchronous>, transform_indices = @transform_7, window_bounds = array<i64: 64, 32>}, {pipeline_mode = #tpu.pipeline_mode<synchronous>, transform_indices = @transform_8, window_bounds = array<i64: 1, 32>}, {pipeline_mode = #tpu.pipeline_mode<synchronous>, transform_indices = @transform_9, window_bounds = array<i64: 32, 128>}, {pipeline_mode = #tpu.pipeline_mode<synchronous>, transform_indices = @transform_10, window_bounds = array<i64: 1, 128>}, {pipeline_mode = #tpu.pipeline_mode<synchronous>, transform_indices = @transform_11, window_bounds = array<i64: 256, 64>}, {transform_indices = @transform_12, window_bounds = array<i64: 256, 128>}]} {
    %c0 = arith.constant 0 : index
    %c0_0 = arith.constant 0 : index
    %0 = vector.load %arg1[%c0, %c0_0] : memref<64x384xbf16, #tpu.memory_space<vmem>>, vector<64x384xbf16>
    %c0_1 = arith.constant 0 : index
    %c0_2 = arith.constant 0 : index
    %1 = vector.load %arg2[%c0_1, %c0_2] : memref<384x256xbf16, #tpu.memory_space<vmem>>, vector<384x256xbf16>
    %cst = arith.constant dense<0.000000e+00> : vector<64x256xf32>
    %2 = tpu.matmul %0, %1, %cst {dimension_numbers = #tpu.dot_dimension_numbers<[1], [0], [0], [1], [0, 0, 1, 1], [], []>} : vector<64x384xbf16>, vector<384x256xbf16>, vector<64x256xf32> -> vector<64x256xf32>
    %c0_3 = arith.constant 0 : index
    %c0_4 = arith.constant 0 : index
    %3 = vector.load %arg3[%c0_3, %c0_4] : memref<1x256xf32, #tpu.memory_space<vmem>>, vector<1x256xf32>
    %4 = vector.broadcast %3 : vector<1x256xf32> to vector<64x256xf32>
    %5 = arith.addf %2, %4 : vector<64x256xf32>
    %cst_5 = arith.constant 0.000000e+00 : f32
    %6 = vector.broadcast %cst_5 : f32 to vector<64x256xf32>
    %7 = arith.maximumf %5, %6 : vector<64x256xf32>
    %8 = arith.truncf %7 : vector<64x256xf32> to vector<64x256xbf16>
    %c0_6 = arith.constant 0 : index
    %c0_7 = arith.constant 0 : index
    %9 = vector.load %arg4[%c0_6, %c0_7] : memref<256x128xbf16, #tpu.memory_space<vmem>>, vector<256x128xbf16>
    %cst_8 = arith.constant dense<0.000000e+00> : vector<64x128xf32>
    %10 = tpu.matmul %8, %9, %cst_8 {dimension_numbers = #tpu.dot_dimension_numbers<[1], [0], [0], [1], [0, 0, 1, 1], [], []>} : vector<64x256xbf16>, vector<256x128xbf16>, vector<64x128xf32> -> vector<64x128xf32>
    %c0_9 = arith.constant 0 : index
    %c0_10 = arith.constant 0 : index
    %11 = vector.load %arg5[%c0_9, %c0_10] : memref<1x128xf32, #tpu.memory_space<vmem>>, vector<1x128xf32>
    %12 = vector.broadcast %11 : vector<1x128xf32> to vector<64x128xf32>
    %13 = arith.addf %10, %12 : vector<64x128xf32>
    %cst_11 = arith.constant 0.000000e+00 : f32
    %14 = vector.broadcast %cst_11 : f32 to vector<64x128xf32>
    %15 = arith.maximumf %13, %14 : vector<64x128xf32>
    %16 = arith.truncf %15 : vector<64x128xf32> to vector<64x128xbf16>
    %c0_12 = arith.constant 0 : index
    %c0_13 = arith.constant 0 : index
    %17 = vector.load %arg6[%c0_12, %c0_13] : memref<128x64xbf16, #tpu.memory_space<vmem>>, vector<128x64xbf16>
    %cst_14 = arith.constant dense<0.000000e+00> : vector<64x64xf32>
    %18 = tpu.matmul %16, %17, %cst_14 {dimension_numbers = #tpu.dot_dimension_numbers<[1], [0], [0], [1], [0, 0, 1, 1], [], []>} : vector<64x128xbf16>, vector<128x64xbf16>, vector<64x64xf32> -> vector<64x64xf32>
    %c0_15 = arith.constant 0 : index
    %c0_16 = arith.constant 0 : index
    %19 = vector.load %arg7[%c0_15, %c0_16] : memref<1x64xf32, #tpu.memory_space<vmem>>, vector<1x64xf32>
    %20 = vector.broadcast %19 : vector<1x64xf32> to vector<64x64xf32>
    %21 = arith.addf %18, %20 : vector<64x64xf32>
    %cst_17 = arith.constant 0.000000e+00 : f32
    %22 = vector.broadcast %cst_17 : f32 to vector<64x64xf32>
    %23 = arith.maximumf %21, %22 : vector<64x64xf32>
    %24 = arith.truncf %23 : vector<64x64xf32> to vector<64x64xbf16>
    %c0_18 = arith.constant 0 : index
    %c0_19 = arith.constant 0 : index
    %25 = vector.load %arg8[%c0_18, %c0_19] : memref<64x32xbf16, #tpu.memory_space<vmem>>, vector<64x32xbf16>
    %cst_20 = arith.constant dense<0.000000e+00> : vector<64x32xf32>
    %26 = tpu.matmul %24, %25, %cst_20 {dimension_numbers = #tpu.dot_dimension_numbers<[1], [0], [0], [1], [0, 0, 1, 1], [], []>} : vector<64x64xbf16>, vector<64x32xbf16>, vector<64x32xf32> -> vector<64x32xf32>
    %c0_21 = arith.constant 0 : index
    %c0_22 = arith.constant 0 : index
    %27 = vector.load %arg9[%c0_21, %c0_22] : memref<1x32xf32, #tpu.memory_space<vmem>>, vector<1x32xf32>
    %28 = vector.broadcast %27 : vector<1x32xf32> to vector<64x32xf32>
    %29 = arith.addf %26, %28 : vector<64x32xf32>
    %cst_23 = arith.constant 0.000000e+00 : f32
    %30 = vector.broadcast %cst_23 : f32 to vector<64x32xf32>
    %31 = arith.maximumf %29, %30 : vector<64x32xf32>
    %32 = arith.truncf %31 : vector<64x32xf32> to vector<64x32xbf16>
    %c0_24 = arith.constant 0 : index
    %c0_25 = arith.constant 0 : index
    %33 = vector.load %arg10[%c0_24, %c0_25] : memref<32x128xbf16, #tpu.memory_space<vmem>>, vector<32x128xbf16>
    %cst_26 = arith.constant dense<0.000000e+00> : vector<64x128xf32>
    %34 = tpu.matmul %32, %33, %cst_26 {dimension_numbers = #tpu.dot_dimension_numbers<[1], [0], [0], [1], [0, 0, 1, 1], [], []>} : vector<64x32xbf16>, vector<32x128xbf16>, vector<64x128xf32> -> vector<64x128xf32>
    %c0_27 = arith.constant 0 : index
    %c0_28 = arith.constant 0 : index
    %35 = vector.load %arg11[%c0_27, %c0_28] : memref<1x128xf32, #tpu.memory_space<vmem>>, vector<1x128xf32>
    %36 = vector.broadcast %35 : vector<1x128xf32> to vector<64x128xf32>
    %37 = arith.addf %34, %36 : vector<64x128xf32>
    %c0_29 = arith.constant 0 : index
    %c0_30 = arith.constant 0 : index
    %38 = vector.load %arg12[%c0_29, %c0_30] : memref<256x64xf32, #tpu.memory_space<vmem>>, vector<256x64xf32>
    %cst_31 = arith.constant dense<0.000000e+00> : vector<256x128xf32>
    %39 = tpu.matmul %38, %37, %cst_31 {dimension_numbers = #tpu.dot_dimension_numbers<[1], [0], [0], [1], [0, 0, 1, 1], [], []>} : vector<256x64xf32>, vector<64x128xf32>, vector<256x128xf32> -> vector<256x128xf32>
    %c0_32 = arith.constant 0 : index
    %c0_33 = arith.constant 0 : index
    %40 = vector.load %arg13[%c0_32, %c0_33] : memref<256x128xf32, #tpu.memory_space<vmem>>, vector<256x128xf32>
    tpu.vector_store %arg13[%c0_32, %c0_33], %39 {strides = array<i32>} : memref<256x128xf32, #tpu.memory_space<vmem>>, vector<256x128xf32>,
    return
  }
  func.func @transform_0(%arg0: i32) -> (i32, i32) {
    %c0_i32 = arith.constant 0 : i32
    %c0_i32_0 = arith.constant 0 : i32
    return %arg0, %c0_i32 : i32, i32
  }
  func.func @transform_1(%arg0: i32) -> (i32, i32) {
    %c0_i32 = arith.constant 0 : i32
    %c0_i32_0 = arith.constant 0 : i32
    %c0_i32_1 = arith.constant 0 : i32
    return %c0_i32, %c0_i32_0 : i32, i32
  }
  func.func @transform_2(%arg0: i32) -> (i32, i32) {
    %c0_i32 = arith.constant 0 : i32
    %c0_i32_0 = arith.constant 0 : i32
    %c0_i32_1 = arith.constant 0 : i32
    return %c0_i32, %c0_i32_0 : i32, i32
  }
  func.func @transform_3(%arg0: i32) -> (i32, i32) {
    %c0_i32 = arith.constant 0 : i32
    %c0_i32_0 = arith.constant 0 : i32
    %c0_i32_1 = arith.constant 0 : i32
    return %c0_i32, %c0_i32_0 : i32, i32
  }
  func.func @transform_4(%arg0: i32) -> (i32, i32) {
    %c0_i32 = arith.constant 0 : i32
    %c0_i32_0 = arith.constant 0 : i32
    %c0_i32_1 = arith.constant 0 : i32
    return %c0_i32, %c0_i32_0 : i32, i32
  }
  func.func @transform_5(%arg0: i32) -> (i32, i32) {
    %c0_i32 = arith.constant 0 : i32
    %c0_i32_0 = arith.constant 0 : i32
    %c0_i32_1 = arith.constant 0 : i32
    return %c0_i32, %c0_i32_0 : i32, i32
  }
  func.func @transform_6(%arg0: i32) -> (i32, i32) {
    %c0_i32 = arith.constant 0 : i32
    %c0_i32_0 = arith.constant 0 : i32
    %c0_i32_1 = arith.constant 0 : i32
    return %c0_i32, %c0_i32_0 : i32, i32
  }
  func.func @transform_7(%arg0: i32) -> (i32, i32) {
    %c0_i32 = arith.constant 0 : i32
    %c0_i32_0 = arith.constant 0 : i32
    %c0_i32_1 = arith.constant 0 : i32
    return %c0_i32, %c0_i32_0 : i32, i32
  }
  func.func @transform_8(%arg0: i32) -> (i32, i32) {
    %c0_i32 = arith.constant 0 : i32
    %c0_i32_0 = arith.constant 0 : i32
    %c0_i32_1 = arith.constant 0 : i32
    return %c0_i32, %c0_i32_0 : i32, i32
  }
  func.func @transform_9(%arg0: i32) -> (i32, i32) {
    %c0_i32 = arith.constant 0 : i32
    %c0_i32_0 = arith.constant 0 : i32
    %c0_i32_1 = arith.constant 0 : i32
    return %c0_i32, %c0_i32_0 : i32, i32
  }
  func.func @transform_10(%arg0: i32) -> (i32, i32) {
    %c0_i32 = arith.constant 0 : i32
    %c0_i32_0 = arith.constant 0 : i32
    %c0_i32_1 = arith.constant 0 : i32
    return %c0_i32, %c0_i32_0 : i32, i32
  }
  func.func @transform_11(%arg0: i32) -> (i32, i32) {
    %c0_i32 = arith.constant 0 : i32
    %c0_i32_0 = arith.constant 0 : i32
    %c0_i32_1 = arith.constant 0 : i32
    return %c0_i32, %c0_i32_0 : i32, i32
  }
  func.func @transform_12(%arg0: i32) -> (i32, i32) {
    %c0_i32 = arith.constant 0 : i32
    %c0_i32_0 = arith.constant 0 : i32
    return %arg0, %c0_i32 : i32, i32
  }
}

</mosaic_0001>

<bundles_post_ra>
// kernel: tpu_custom_call.1
= control target key start
LH: loop header
LB: loop body
LE: loop exit
PB: predicated region body
PF: predicated region fallthrough
CT: control target
= control target key end

     0   :  { %s3489_s0 = inlined_call_operand.hbm [shape: bf16[128,384], index: 0, kind: input, shape index: {}]   ;;  %s3490_s1 = inlined_call_operand.vmem [shape: bf16[384,256], index: 1, kind: input, shape index: {}]   ;;  %s3491_s2 = inlined_call_operand.vmem [shape: f32[1,256], index: 2, kind: input, shape index: {}]   ;;  %s3492_s3 = inlined_call_operand.hbm [shape: bf16[256,128], index: 3, kind: input, shape index: {}]   ;;  %s3493_s4 = inlined_call_operand.vmem [shape: f32[1,128], index: 4, kind: input, shape index: {}]   ;;  %s3494_s5 = inlined_call_operand.vmem [shape: bf16[128,64], index: 5, kind: input, shape index: {}]   ;;  %s3495_s6 = inlined_call_operand.vmem [shape: f32[1,64], index: 6, kind: input, shape index: {}]   ;;  %s3496_s7 = inlined_call_operand.vmem [shape: bf16[64,32], index: 7, kind: input, shape index: {}]   ;;  %s3497_s8 = inlined_call_operand.vmem [shape: f32[1,32], index: 8, kind: input, shape index: {}]   ;;  %s3498_s9 = inlined_call_operand.vmem [shape: bf16[32,128], index: 9, kind: input, shape index: {}]   ;;  %s3499_s10 = inlined_call_operand.vmem [shape: f32[1,128], index: 10, kind: input, shape index: {}]   ;;  %s3500_s11 = inlined_call_operand.vmem [shape: f32[256,64], index: 11, kind: input, shape index: {}]   ;;  %s3501_s12 = inlined_call_operand.hbm [shape: f32[512,128], index: 12, kind: output, shape index: {}]  }
   0x1   :  { %3510 = sst [smem:[#allocation14_spill]] %s3492_s3 }
   0x2   :  { %3511 = sst [smem:[#allocation15_spill]] %s3499_s10 }
   0x3   :  { %3512 = sst [smem:[#allocation16_spill]] %s3501_s12 }
   0x4   :  { %17 = vsyncpa [#allocation3], 0 }
   0x5   :  { %19 = vsyncpa [#allocation3 + $0x1], 0 }
   0x6   :  { %20 = vsyncpa [#allocation6], 0 }
   0x7   :  { %21 = vsyncpa [#allocation4], 0 }
   0x8   :  { %23 = vsyncpa [#allocation4 + $0x1], 0  ;;  %s2891_s21 = smov 0   ;;  %s2893_s22 = smov 0  }
   0x9   :  { %s2895_s23 = smov 0   ;;  %s2897_s24 = smov 0  }
   0xa LB: > { %3513 = sst [smem:[#allocation11_spill]] %s2802_s21  ;;  %s2912_s25 = sadd.s32 4294967295, %s2814_s24   ;;  %s2814_s24 = sphi %s2897_s24, %s3534_s24   ;;  %s2810_s23 = sphi %s2895_s23, %s3537_s23   ;;  %s2806_s22 = sphi %s2893_s22, %s3536_s22   ;;  %s2802_s21 = sphi %s2891_s21, %s3535_s21  }
   0xb   : > { %s2073_s26 = sadd.s32 4294967294, %s2814_s24   ;;  %p49_p0 = scmp.ne.s32.totalorder %s2806_s22, %s2802_s21 }
   0xc   : > { %p3506_p1 = scmp.eq.s32.totalorder %s2912_s25, 0  ;;  %p310_p3 = scmp.eq.s32.totalorder %s2073_s26, 1 }
   0xd   : > { %p2074_p5 = scmp.ge.s32.totalorder %s2814_s24, 1  ;;  %p317_p7 = scmp.lt.s32.totalorder %s2814_s24, 3 }
   0xe   : > { %p2921_p4 = por %p3506_p1, %p49_p0  ;;  %p2926_p6 = por %p310_p3, %p49_p0 }
   0xf   : > { %p2931_p8 = pnand %p2074_p5, %p317_p7  ;;  %s2816_s30 = smov [#allocation5]  }
  0x10   : > { %s3514_s27 = scalar_select %p2921_p4, 1, 0 }
  0x11   : > { %s3515_s28 = scalar_select %p2926_p6, 1, 0 }
  0x12   : > { %s3517_s29 = scalar_select %p2931_p8, 1, 0 }
  0x13   : > { %3516 = sst [smem:[#allocation12_spill]] %s3515_s28  ;;  %s335_s13 = sshll.u32 %s2816_s30, 4  ;;  %s2935_s13 = int_to_ptr.vmem [resolvable:$true] %s335_s13 }
  0x14   : > { %p2512_p9 = pneg %p2931_p8  ;;  %s2947_s15 = sadd.s32 1, %s2814_s24  }
  0x15   : > { %3519 = sst [smem:[#allocation13_spill]] %s2947_s15  ;;  %s36_s16 = sadd.s32 1, %s2810_s23 }
  0x16   : > { %p2942_p11 = pnand %p2512_p9, %p3506_p1  ;;  %s33_s17 = ssub.s32 %s2814_s24, %s2947_s15 }
  0x17   : > { %s3520_s3 = sld [smem:[#allocation14_spill]] }
  0x18   : > { %p2688_p13 = pneg %p2942_p11 }
  0x1d   : > { %s2686_s20 = scalar_lea.hbm %s3520_s3, 2048 }
  0x1e   : > { %p2687_p12 = scmp.ne.s32.totalorder %s3520_s3, %s2686_s20  ;;  %p2693_p5 = scmp.lt.u32.totalorder %s2686_s20, %s3520_s3 }
  0x20   : > { %p2689_p0 = pnand %p2688_p13, %p2687_p12 }
  0x22   : > { %p2690_p3 = pneg %p2689_p0 }
  0x24   : > { %p2695_p7 = pnand %p2693_p5, %p2690_p3 }
  0x26   : > { %2698 = shalt.err (!%p2695_p7)
}
  0x27   : > { %s2699_s15 = scalar_lea.vmem %s2935_s13, 2048  ;;  %p2707_p2 = scmp.lt.s32.totalorder %s2935_s13, %s2935_s13 }
  0x28   : > { %p2700_p9 = scmp.ne.s32.totalorder %s2935_s13, %s2699_s15  ;;  %p2708_p6 = scmp.lt.s32.totalorder %s2699_s15, %s2699_s15 }
  0x2a   : > { %p2702_p10 = pnand %p2700_p9, %p2688_p13  ;;  %p2709_p4 = por %p2708_p6, %p2707_p2 }
  0x2c   : > { %p2703_p1 = pneg %p2702_p10 }
  0x2e   : > { %p2710_p8 = pnand %p2709_p4, %p2703_p1 }
  0x30   : > { %2713 = shalt.err (!%p2710_p8)
}
  0x31   : > { %s2817_s18 = smov 64   ;;  %s2818_s21 = smov 4  }
  0x32   : > { %2515 = dma.hbm_to_vmem [thread:$0]  (!%p2942_p11), %s3520_s3, 2048, %s2935_s13, [#allocation6], %s2817_s18, %s2817_s18, %s2818_s21  }
  0x33   : > { %p34_p2 = scmp.eq.s32.totalorder %s33_s17, 0  ;;  %p43_p1 = scmp.ne.s32.totalorder %s2810_s23, %s2806_s22 }
  0x34   : > { %p44_p4 = scmp.eq.s32.totalorder %s2814_s24, 0  ;;  %p2525_p6 = scmp.lt.s32.totalorder %s2814_s24, 2 }
  0x35   : > { %s2978_s15 = scalar_select %p34_p2, %s2810_s23, %s36_s16  }
  0x36   : > { %p45_p8 = por %p44_p4, %p43_p1  ;;  %p3521_p10 = scmp.eq.s32.totalorder %s2912_s25, 1 }
  0x37   : > { %s373_s26 = sand.u32 1, %s2810_s23   ;;  %s2502_s30 = smul.u32 1536, %s2814_s24 }
  0x38   : > { %p2982_p12 = por %p3521_p10, %p43_p1  ;;  %s2501_s12 = smul.u32 96, %s373_s26 }
  0x39   : > { %s2991_s28 = scalar_lea.hbm %s3489_s0, %s2502_s30  ;;  %p2993_p11 = pnand %p2525_p6, %p45_p8 }
  0x3a   : > { %s377_s16 = scalar_lea.vmem [#allocation2], %s2501_s12  ;;  %s2999_s18 = scalar_lea.sflag [#allocation3], %s373_s26 }
  0x3b   : > { %s385_s17 = sshll.u32 %s377_s16, 4  ;;  %s2714_s21 = scalar_lea.hbm %s2991_s28, 1536  ;;  %s2997_s17 = int_to_ptr.vmem [resolvable:$true] %s385_s17 }
  0x3c   : > { %p2715_p13 = scmp.ne.s32.totalorder %s2991_s28, %s2714_s21  ;;  %p2716_p0 = pneg %p2993_p11 }
  0x3d   : > { %s2719_s30 = scalar_lea.hbm %s3489_s0, 3072  ;;  %p2720_p7 = scmp.lt.u32.totalorder %s2991_s28, %s3489_s0 }
  0x3e   : > { %p2717_p3 = pnand %p2716_p0, %p2715_p13  ;;  %p2721_p9 = scmp.lt.u32.totalorder %s2719_s30, %s2714_s21 }
  0x3f   : > { %p2723_p1 = scmp.lt.u32.totalorder %s2714_s21, %s2991_s28 }
  0x40   : > { %p2718_p5 = pneg %p2717_p3  ;;  %p2722_p2 = por %p2721_p9, %p2720_p7 }
  0x42   : > { %p2724_p4 = por %p2723_p1, %p2722_p2 }
  0x44   : > { %p2725_p6 = pnand %p2724_p4, %p2718_p5 }
  0x46   : > { %2728 = shalt.err (!%p2725_p6)
}
  0x47   : > { %s2729_s12 = scalar_lea.vmem %s2997_s17, 1536  ;;  %s2819_s26 = smov [#allocation2]  }
  0x48   : > { %p2730_p8 = scmp.ne.s32.totalorder %s2997_s17, %s2729_s12  ;;  %s2734_s16 = sshll.u32 %s2819_s26, 4  ;;  %s2735_s16 = int_to_ptr.vmem [resolvable:$false] %s2734_s16 }
  0x49   : > { %s2736_s3 = scalar_lea.vmem %s2735_s16, 3072  ;;  %p2737_p3 = scmp.lt.s32.totalorder %s2997_s17, %s2735_s16 }
  0x4a   : > { %p2732_p10 = pnand %p2730_p8, %p2716_p0  ;;  %p2738_p7 = scmp.lt.s32.totalorder %s2736_s3, %s2729_s12 }
  0x4c   : > { %p2733_p13 = pneg %p2732_p10  ;;  %p2739_p9 = por %p2738_p7, %p2737_p3 }
  0x4e   : > { %p2740_p2 = pnand %p2739_p9, %p2733_p13 }
  0x50   : > { %2743 = shalt.err (!%p2740_p2)
}
  0x51   : > { %s2820_s21 = smov 192   ;;  %s2821_s10 = smov 12  }
  0x52   : > { %2519 = dma.hbm_to_vmem [thread:$0]  (!%p2993_p11), %s2991_s28, 1536, %s2997_s17, %s2999_s18, %s2820_s21, %s2820_s21, %s2821_s10  }
  0x53   : > { %p3524_p0 = scmp.ne.s32.totalorder %s3517_s29, 0 }
  0x54   : > { %s3030_s19 = sand.u32 (!%p3524_p0), 1, %s2806_s22   ;;  %p3525_p5 = scmp.ne.s32.totalorder (!%p3524_p0), %s3514_s27, 0 }
  0x55   : > { %397 = sbr.rel (%p3524_p0) target bundleno = 1597 (0x63d), region = 68  ;;  %s400_s14 = scalar_lea.sflag (!%p3524_p0), [#allocation3], %s3030_s19 }
  0x56   : > { %s2503_s30 = smul.u32 (!%p3524_p0), 96, %s3030_s19 }
  0x58   : > { %s3034_s12 = scalar_lea.vmem (!%p3524_p0), [#allocation2], %s2503_s30 }
  0x5c   : > { %2789 = dma.done.wait (%p3525_p5), %s400_s14, 1536  }
  0x5d   : > { %2791 = vsyncadd (%p3525_p5), %s400_s14, 4294965760  ;;  %p3526_p11 = scmp.eq.s32.totalorder %s2912_s25, 0 }
  0x5f   : > { %2793 = dma.done.wait (%p3526_p11), [#allocation6], 2048   ;;  %p3527_p1 = pmov %p3526_p11 }
  0x60   : > { %v2568_v0 = vld [vmem:[%s3490_s1 + $0x4] ss:$8 sps:$4 sm:$0xff]   ;;  %v2570_v1 = vld [vmem:[%s3490_s1] ss:$8 sps:$4 sm:$0xff]   ;;  %v2571_v2 = vld [vmem:[%s3490_s1 + $0x14] ss:$8 sps:$4 sm:$0xff]  }
  0x61   : > { %2795 = vsyncadd (%p3527_p1), [#allocation6], 4294965248  ;;  %831 = vmatprep.subr.bf16.mxu0 %v2568_v0  ;;  %v2573_v3 = vld [vmem:[%s3490_s1 + $0x10] ss:$8 sps:$4 sm:$0xff]   ;;  %v2574_v4 = vld [vmem:[%s3490_s1 + $0x24] ss:$8 sps:$4 sm:$0xff]  }
  0x62   : > { %832 = vmatpush1.bf16.msra.mxu0 %v2570_v1  ;;  %v2576_v5 = vld [vmem:[%s3490_s1 + $0x20] ss:$8 sps:$4 sm:$0xff]   ;;  %v2577_v6 = vld [vmem:[%s3490_s1 + $0x34] ss:$8 sps:$4 sm:$0xff]   ;;  %v2579_v7 = vld [vmem:[%s3490_s1 + $0x30] ss:$8 sps:$4 sm:$0xff]  }
  0x63   : > { %833 = vmatprep.subr.bf16.mxu0 %v2571_v2  ;;  %v2580_v8 = vld [vmem:[%s3490_s1 + $0x44] ss:$8 sps:$4 sm:$0xff]   ;;  %v2582_v9 = vld [vmem:[%s3490_s1 + $0x40] ss:$8 sps:$4 sm:$0xff]   ;;  %v2583_v10 = vld [vmem:[%s3490_s1 + $0x54] ss:$8 sps:$4 sm:$0xff]  }
  0x64   : > { %v2585_v11 = vld [vmem:[%s3490_s1 + $0x50] ss:$8 sps:$4 sm:$0xff]   ;;  %v2586_v12 = vld [vmem:[%s3490_s1 + $0x64] ss:$8 sps:$4 sm:$0xff]   ;;  %v2588_v14 = vld [vmem:[%s3490_s1 + $0x60] ss:$8 sps:$4 sm:$0xff]  }
  0x65   : > { %v2618_v13 = vld [vmem:[%s3034_s12 + $0x4] ss:$12 sps:$4 sm:$0xff]   ;;  %v2589_v15 = vld [vmem:[%s3490_s1 + $0x74] ss:$8 sps:$4 sm:$0xff]   ;;  %v2594_v18 = vld [vmem:[%s3490_s1 + $0x80] ss:$8 sps:$4 sm:$0xff]  }
  0x66   : > { %834 = vmatpush1.bf16.msra.mxu0 %v2573_v3  ;;  %863 = vmatprep.mubr.bf16.mxu0 %v2618_v13  ;;  %v2591_v16 = vld [vmem:[%s3490_s1 + $0x70] ss:$8 sps:$4 sm:$0xff]   ;;  %v2592_v17 = vld [vmem:[%s3490_s1 + $0x84] ss:$8 sps:$4 sm:$0xff]   ;;  %v2595_v19 = vld [vmem:[%s3490_s1 + $0x94] ss:$8 sps:$4 sm:$0xff]  }
  0x67   : > { %835 = vmatprep.subr.bf16.mxu0 %v2574_v4  ;;  %v2597_v20 = vld [vmem:[%s3490_s1 + $0x90] ss:$8 sps:$4 sm:$0xff]   ;;  %v2598_v21 = vld [vmem:[%s3490_s1 + $0xa4] ss:$8 sps:$4 sm:$0xff]   ;;  %v2600_v22 = vld [vmem:[%s3490_s1 + $0xa0] ss:$8 sps:$4 sm:$0xff]  }
  0x68   : > { %v2601_v23 = vld [vmem:[%s3490_s1 + $0xb4] ss:$8 sps:$4 sm:$0xff]   ;;  %v2603_v24 = vld [vmem:[%s3490_s1 + $0xb0] ss:$8 sps:$4 sm:$0xff]   ;;  %v2604_v25 = vld [vmem:[%s3490_s1 + $0xc4] ss:$8 sps:$4 sm:$0xff]  }
  0x69   : > { %v2656_v26 = vld [vmem:[#allocation5 + $0x40] sm:$0xff]   ;;  %v2658_v28 = vld [vmem:[#allocation5 + $0x48] sm:$0xff]   ;;  %v2660_v30 = vld [vmem:[#allocation5 + $0x50] sm:$0xff]   ;;  %v2822_v3 = vmov 0   ;;  %vm1400_vm0 = vcmask 523264   ;;  %vm1513_vm1 = vcmask 261120  }
  0x6a   : > { %836 = vmatpush1.bf16.msra.mxu0 %v2576_v5  ;;  %v2657_v27 = vld [vmem:[#allocation5] sm:$0xff]   ;;  %2223 = vmatprep.subr.bf16.mxu1 %v2656_v26  ;;  %v2659_v29 = vld [vmem:[#allocation5 + $0x8] sm:$0xff]   ;;  %v2607_v32 = vld [vmem:[%s3490_s1 + $0xd4] ss:$8 sps:$4 sm:$0xff]   ;;  %s3528_s26 = sld [smem:[#allocation15_spill]]  ;;  %s2082_s21 = sshll.u32 %s3030_s19, 8 }
  0x6b   : > { %837 = vmatprep.subr.bf16.mxu0 %v2577_v6  ;;  %2224 = vmatpush3.bf16.msra.mxu1 %v2657_v27  ;;  %v2606_v31 = vld [vmem:[%s3490_s1 + $0xc0] ss:$8 sps:$4 sm:$0xff]   ;;  %v2609_v33 = vld [vmem:[%s3490_s1 + $0xd0] ss:$8 sps:$4 sm:$0xff]   ;;  %v2610_v36 = vld [vmem:[%s3490_s1 + $0xe4] ss:$8 sps:$4 sm:$0xff]  }
  0x6c   : > { %2225 = vmatprep.subr.bf16.mxu1 %v2658_v28  ;;  %v2661_v34 = vld [vmem:[#allocation5 + $0x10] sm:$0xff]   ;;  %v2662_v35 = vld [vmem:[#allocation5 + $0x58] sm:$0xff]   ;;  %v2664_v38 = vld [vmem:[#allocation5 + $0x60] sm:$0xff]   ;;  %s3404_s10 = scalar_lea.vmem [#allocation7], %s2082_s21  ;;  %s2222_s30 = sshll.u32 %s2912_s25, 12 }
  0x6d   : > { %v2663_v37 = vld [vmem:[#allocation5 + $0x18] sm:$0xff]   ;;  %v2612_v39 = vld [vmem:[%s3490_s1 + $0xe0] ss:$8 sps:$4 sm:$0xff]   ;;  %v2621_v44 = vld [vmem:[%s3490_s1 + $0x104] ss:$8 sps:$4 sm:$0xff]   ;;  %s1990_s14 = sshll.u32 %s3404_s10, 4  ;;  %s3443_s14 = int_to_ptr.vmem [resolvable:$true] %s1990_s14 }
  0x6e   : > { %838 = vmatpush1.bf16.msra.mxu0 %v2579_v7  ;;  %v2613_v40 = vld [vmem:[%s3490_s1 + $0xf4] ss:$8 sps:$4 sm:$0xff]   ;;  %v2665_v41 = vld [vmem:[#allocation5 + $0x20] sm:$0xff]   ;;  %v2666_v42 = vld [vmem:[#allocation5 + $0x68] sm:$0xff]   ;;  %s3529_s13 = sld [smem:[#allocation16_spill]]  ;;  %s1977_s18 = scalar_lea.sflag [#allocation4], %s3030_s19 }
  0x6f   : > { %839 = vmatprep.subr.bf16.mxu0 %v2580_v8  ;;  %2226 = vmatpush3.bf16.msra.mxu1 %v2659_v29  ;;  %v2615_v43 = vld [vmem:[%s3490_s1 + $0xf0] ss:$8 sps:$4 sm:$0xff]   ;;  %v2616_v45 = vld [vmem:[%s3034_s12] ss:$12 sps:$4 sm:$0xff]   ;;  %v2625_v47 = vld [vmem:[%s3034_s12 + $0x1c] ss:$12 sps:$4 sm:$0xff]  }
  0x70   : > { %2227 = vmatprep.subr.bf16.mxu1 %v2660_v30  ;;  %v2619_v46 = vld [vmem:[%s3490_s1 + $0x100] ss:$8 sps:$4 sm:$0xff]   ;;  %v2624_v48 = vld [vmem:[%s3490_s1 + $0x114] ss:$8 sps:$4 sm:$0xff]   ;;  %v2622_v49 = vld [vmem:[%s3490_s1 + $0x110] ss:$8 sps:$4 sm:$0xff]  }
  0x71   : > { %v2630_v50 = vld [vmem:[%s3490_s1 + $0x124] ss:$8 sps:$4 sm:$0xff]   ;;  %v2628_v52 = vld [vmem:[%s3490_s1 + $0x120] ss:$8 sps:$4 sm:$0xff]   ;;  %v2633_v54 = vld [vmem:[%s3490_s1 + $0x134] ss:$8 sps:$4 sm:$0xff]  }
  0x72   : > { %840 = vmatpush1.bf16.msra.mxu0 %v2582_v9  ;;  %v2627_v51 = vld [vmem:[%s3034_s12 + $0x18] ss:$12 sps:$4 sm:$0xff]   ;;  %v2634_v53 = vld [vmem:[%s3034_s12 + $0x34] ss:$12 sps:$4 sm:$0xff]   ;;  %v2636_v57 = vld [vmem:[%s3034_s12 + $0x30] ss:$12 sps:$4 sm:$0xff]  }
  0x73   : > { %841 = vmatprep.subr.bf16.mxu0 %v2583_v10  ;;  %2228 = vmatpush3.bf16.msra.mxu1 %v2661_v34  ;;  %v2631_v55 = vld [vmem:[%s3490_s1 + $0x130] ss:$8 sps:$4 sm:$0xff]   ;;  %v2639_v56 = vld [vmem:[%s3490_s1 + $0x144] ss:$8 sps:$4 sm:$0xff]   ;;  %v2637_v58 = vld [vmem:[%s3490_s1 + $0x140] ss:$8 sps:$4 sm:$0xff]  }
  0x74   : > { %2229 = vmatprep.subr.bf16.mxu1 %v2662_v35  ;;  %v2643_v59 = vld [vmem:[%s3034_s12 + $0x4c] ss:$12 sps:$4 sm:$0xff]   ;;  %v2642_v60 = vld [vmem:[%s3490_s1 + $0x154] ss:$8 sps:$4 sm:$0xff]   ;;  %v2646_v0 = vld [vmem:[%s3490_s1 + $0x160] ss:$8 sps:$4 sm:$0xff]   ;;  %s3441_s17 = scalar_lea.hbm %s3529_s13, %s2222_s30 }
  0x75   : > { %v2640_v61 = vld [vmem:[%s3490_s1 + $0x150] ss:$8 sps:$4 sm:$0xff]   ;;  %v2648_v62 = vld [vmem:[%s3490_s1 + $0x164] ss:$8 sps:$4 sm:$0xff]   ;;  %v2645_v63 = vld [vmem:[%s3034_s12 + $0x48] ss:$12 sps:$4 sm:$0xff]  }
  0x76   : > { %842 = vmatpush1.bf16.msra.mxu0 %v2585_v11  ;;  %v2651_v1 = vld [vmem:[%s3490_s1 + $0x174] ss:$8 sps:$4 sm:$0xff]   ;;  %v2649_v2 = vld [vmem:[%s3490_s1 + $0x170] ss:$8 sps:$4 sm:$0xff]   ;;  %v2653_v5 = vld [vmem:[%s3034_s12 + $0x20] ss:$12 sps:$4 sm:$0xff]  }
  0x77   : > { %843 = vmatprep.subr.bf16.mxu0 %v2586_v12  ;;  %2230 = vmatpush3.bf16.msra.mxu1 %v2663_v37  ;;  %v2652_v4 = vld [vmem:[%s3034_s12 + $0x8] ss:$12 sps:$4 sm:$0xff]   ;;  %v2654_v6 = vld [vmem:[%s3034_s12 + $0x38] ss:$12 sps:$4 sm:$0xff]   ;;  %v2655_v7 = vld [vmem:[%s3034_s12 + $0x50] ss:$12 sps:$4 sm:$0xff]  }
  0x78   : > { %2231 = vmatprep.subr.bf16.mxu1 %v2664_v38  ;;  %v2667_v8 = vld [vmem:[#allocation5 + $0x28] sm:$0xff]   ;;  %v2668_v9 = vld [vmem:[#allocation5 + $0x70] sm:$0xff]   ;;  %v2670_v11 = vld [vmem:[#allocation5 + $0x78] sm:$0xff]   ;;  %s2744_s25 = scalar_lea.vmem %s3443_s14, 4096 }
  0x79   : > { %v2669_v10 = vld [vmem:[#allocation5 + $0x30] sm:$0xff]   ;;  %v2671_v12 = vld [vmem:[#allocation5 + $0x38] sm:$0xff]   ;;  %v2672_v13 = vld [vmem:[%s3494_s5] sm:$0xff]   ;;  %p2745_p4 = scmp.ne.s32.totalorder %s3443_s14, %s2744_s25 }
  0x7a   : > { %844 = vmatpush1.bf16.msra.mxu0 %v2588_v14  ;;  %v517_v14 = vlaneseq  ;;  %v2673_v38 = vld [vmem:[%s3494_s5 + $0x8] sm:$0xff]  }
  0x7b   : > { %845 = vmatprep.subr.bf16.mxu0 %v2589_v15  ;;  %2232 = vmatpush3.bf16.msra.mxu1 %v2665_v41  ;;  %p2746_p6 = pnand %p2745_p4, %p2982_p12 }
  0x7c   : > { %2233 = vmatprep.subr.bf16.mxu1 %v2666_v42  ;;  %v518_v15 = vshrl.u32 %v517_v14, 7 }
  0x7d   : > { %p2747_p8 = pneg %p2746_p6 }
  0x7e   : > { %846 = vmatpush1.bf16.msra.mxu0 %v2591_v16  ;;  %v519_v16 = vsub.s32 0, %v518_v15 }
  0x7f   : > { %847 = vmatprep.subr.bf16.mxu0 %v2592_v17  ;;  %2234 = vmatpush3.bf16.msra.mxu1 %v2667_v8  ;;  %v515_v17 = vld [vmem:[%s3491_s2] sm:$0x3] }
  0x80   : > { %2235 = vmatprep.subr.bf16.mxu1 %v2668_v9 }
  0x82   : > { %848 = vmatpush1.bf16.msra.mxu0 %v2594_v18  ;;  %v523_v18 = vsub.s32 1, %v518_v15  ;;  %v2675_v15 = vld [vmem:[%s3494_s5 + $0x18] sm:$0xff]  }
  0x83   : > { %849 = vmatprep.subr.bf16.mxu0 %v2595_v19  ;;  %2236 = vmatpush3.bf16.msra.mxu1 %v2669_v10  ;;  %v520_v19 = vrot.slane %v515_v17, %v519_v16  ;;  %v2676_v16 = vld [vmem:[%s3494_s5 + $0x20] sm:$0xff]  }
  0x84   : > { %2237 = vmatprep.subr.bf16.mxu1 %v2670_v11 }
  0x86   : > { %850 = vmatpush1.bf16.msra.mxu0 %v2597_v20  ;;  %v3206_v20 = vrot.slane %v515_v17, %v523_v18  ;;  %v2677_v17 = vld [vmem:[%s3494_s5 + $0x28] sm:$0xff]   ;;  %v2678_v18 = vld [vmem:[%s3494_s5 + $0x30] sm:$0xff]  }
  0x87   : > { %851 = vmatprep.subr.bf16.mxu0 %v2598_v21  ;;  %2238 = vmatpush3.bf16.msra.mxu1 %v2671_v12 }
  0x88   : > { %2329 = vmatprep.subr.bf16.mxu1 %v2672_v13 }
  0x8a   : > { %852 = vmatpush1.bf16.msra.mxu0 %v2600_v22 }
  0x8b   : > { %853 = vmatprep.subr.bf16.mxu0 %v2601_v23 }
  0x8e   : > { %854 = vmatpush1.bf16.msra.mxu0 %v2603_v24 }
  0x8f   : > { %855 = vmatprep.subr.bf16.mxu0 %v2604_v25 }
  0x92   : > { %856 = vmatpush1.bf16.msra.mxu0 %v2606_v31 }
  0x93   : > { %857 = vmatprep.subr.bf16.mxu0 %v2607_v32 }
  0x96   : > { %858 = vmatpush1.bf16.msra.mxu0 %v2609_v33 }
  0x97   : > { %859 = vmatprep.subr.bf16.mxu0 %v2610_v36 }
  0x9a   : > { %860 = vmatpush1.bf16.msra.mxu0 %v2612_v39 }
  0x9b   : > { %861 = vmatprep.subr.bf16.mxu0 %v2613_v40 }
  0x9e   : > { %862 = vmatpush1.bf16.msra.mxu0 %v2615_v43 }
  0x9f   : > { %904 = vmatprep.subr.bf16.mxu0 %v2621_v44 }
  0xa1   : > { %864 = vmatmul.mubr.bf16.vlgmr.msra.gmra.mrb[0].mxu0 %v2616_v45 }
  0xa2   : > { %905 = vmatpush1.bf16.msra.mxu0 %v2619_v46  ;;  %873 = vmatprep.mubr.bf16.mxu0 %v2625_v47  ;;  %v2674_v46 = vld [vmem:[%s3494_s5 + $0x10] sm:$0xff]  }
  0xa3   : > { %906 = vmatprep.subr.bf16.mxu0 %v2624_v48 }
  0xa6   : > { %907 = vmatpush1.bf16.msra.mxu0 %v2622_v49 }
  0xa7   : > { %908 = vmatprep.subr.bf16.mxu0 %v2630_v50 }
  0xa9   : > { %874 = vmatmul.mubr.bf16.gmra.mrb[4].mxu0 %v2627_v51 }
  0xaa   : > { %909 = vmatpush1.bf16.msra.mxu0 %v2628_v52  ;;  %883 = vmatprep.mubr.bf16.mxu0 %v2634_v53 }
  0xab   : > { %910 = vmatprep.subr.bf16.mxu0 %v2633_v54 }
  0xae   : > { %911 = vmatpush1.bf16.msra.mxu0 %v2631_v55 }
  0xaf   : > { %912 = vmatprep.subr.bf16.mxu0 %v2639_v56 }
  0xb1   : > { %884 = vmatmul.mubr.bf16.gmra.mrb[8].mxu0 %v2636_v57 }
  0xb2   : > { %913 = vmatpush1.bf16.msra.mxu0 %v2637_v58  ;;  %893 = vmatprep.mubr.bf16.mxu0 %v2643_v59 }
  0xb3   : > { %914 = vmatprep.subr.bf16.mxu0 %v2642_v60 }
  0xb6   : > { %915 = vmatpush1.bf16.msra.mxu0 %v2640_v61 }
  0xb7   : > { %916 = vmatprep.subr.bf16.mxu0 %v2648_v62 }
  0xb9   : > { %894 = vmatmul.mubr.bf16.gmra.mrb[12].mxu0 %v2645_v63 }
  0xba   : > { %917 = vmatpush1.bf16.msra.mxu0 %v2646_v0  ;;  %936 = vmatprep.mubr.bf16.mxu0 %v2822_v3 }
  0xbb   : > { %918 = vmatprep.subr.bf16.mxu0 %v2651_v1 }
  0xbe   : > { %919 = vmatpush1.bf16.msra.mxu0 %v2649_v2 }
  0xc1   : > { %937 = vmatmul.mubr.bf16.vlgmr.msra.gmra.mrb[0].mxu0 %v2652_v4 }
  0xc2   : > { %946 = vmatprep.mubr.bf16.mxu0 %v2822_v3 }
  0xc9   : > { %947 = vmatmul.mubr.bf16.gmra.mrb[4].mxu0 %v2653_v5 }
  0xca   : > { %956 = vmatprep.mubr.bf16.mxu0 %v2822_v3 }
  0xd1   : > { %957 = vmatmul.mubr.bf16.gmra.mrb[8].mxu0 %v2654_v6 }
  0xd2   : > { %966 = vmatprep.mubr.bf16.mxu0 %v2822_v3 }
  0xd9   : > { %967 = vmatmul.mubr.bf16.gmra.mrb[12].mxu0 %v2655_v7 }
 0x194   : > { %v938_v21 = vpop.f32.mrb[0].mxu0 }
 0x195   : > { %v2469_v22 = vadd.f32 %v938_v21, %v520_v19  ;;  %v940_v23 = vpop.f32.mrb[1].mxu0 }
 0x196   : > { %v2470_v24 = vadd.f32 %v940_v23, %v3206_v20  ;;  %v942_v25 = vpop.f32.mrb[2].mxu0 }
 0x197   : > { %v2471_v26 = vadd.f32 %v942_v25, %v520_v19  ;;  %v944_v27 = vpop.f32.mrb[3].mxu0  ;;  %v977_v29 = vmax.f32 %v2469_v22, 0.0  ;;  %v2143_v22 = vld [vmem:[%s3493_s4] ss:$0 sm:$0xff] }
 0x198   : > { %v2472_v28 = vadd.f32 %v944_v27, %v3206_v20  ;;  %v978_v31 = vmax.f32 %v2470_v24, 0.0 }
 0x199   : > { %v979_v30 = vmax.f32 %v2471_v26, 0.0 }
 0x19a   : > { %v980_v32 = vmax.f32 %v2472_v28, 0.0 }
 0x19b   : > { %v993_v33 = vpack.c.bf16 %v979_v30, %v977_v29 }
 0x19c   : > { %v948_v34 = vpop.f32.mrb[4].mxu0  ;;  %v994_v35 = vpack.c.bf16 %v980_v32, %v978_v31 }
 0x19d   : > { %v2473_v36 = vadd.f32 %v948_v34, %v520_v19  ;;  %v950_v37 = vpop.f32.mrb[5].mxu0 }
 0x19e   : > { %v2474_v39 = vadd.f32 %v950_v37, %v3206_v20  ;;  %v952_v40 = vpop.f32.mrb[6].mxu0  ;;  %1168 = vmatprep.mubr.bf16.mxu1 %v994_v35 }
 0x19f   : > { %v2475_v41 = vadd.f32 %v952_v40, %v520_v19  ;;  %v954_v42 = vpop.f32.mrb[7].mxu0  ;;  %1169 = vmatmul.mubr.bf16.vlgmr.msra.gmra.mrb[0].mxu1 %v993_v33  ;;  %v981_v44 = vmax.f32 %v2473_v36, 0.0 }
 0x1a0   : > { %v2476_v43 = vadd.f32 %v954_v42, %v3206_v20  ;;  %2330 = vmatpush3.bf16.msra.mxu1 %v2672_v13  ;;  %v982_v47 = vmax.f32 %v2474_v39, 0.0 }
 0x1a1   : > { %v983_v45 = vmax.f32 %v2475_v41, 0.0  ;;  %2331 = vmatprep.subr.bf16.mxu1 %v2673_v38 }
 0x1a2   : > { %v984_v48 = vmax.f32 %v2476_v43, 0.0 }
 0x1a3   : > { %v995_v49 = vpack.c.bf16 %v983_v45, %v981_v44 }
 0x1a4   : > { %v996_v50 = vpack.c.bf16 %v984_v48, %v982_v47  ;;  %v958_v51 = vpop.f32.mrb[8].mxu0  ;;  %2332 = vmatpush3.bf16.msra.mxu1 %v2673_v38  ;;  %v2681_v48 = vld [vmem:[%s3496_s7 + $0x8] sm:$0xff]  }
 0x1a5   : > { %v2477_v52 = vadd.f32 %v958_v51, %v520_v19  ;;  %v960_v53 = vpop.f32.mrb[9].mxu0  ;;  %2333 = vmatprep.subr.bf16.mxu1 %v2674_v46 }
 0x1a6   : > { %v2478_v54 = vadd.f32 %v960_v53, %v3206_v20  ;;  %v962_v55 = vpop.f32.mrb[10].mxu0  ;;  %1176 = vmatprep.mubr.bf16.mxu1 %v996_v50 }
 0x1a7   : > { %v2479_v56 = vadd.f32 %v962_v55, %v520_v19  ;;  %v964_v57 = vpop.f32.mrb[11].mxu0  ;;  %1177 = vmatmul.mubr.bf16.gmra.mrb[4].mxu1 %v995_v49  ;;  %v985_v59 = vmax.f32 %v2477_v52, 0.0 }
 0x1a8   : > { %v2480_v58 = vadd.f32 %v964_v57, %v3206_v20  ;;  %2334 = vmatpush3.bf16.msra.mxu1 %v2674_v46  ;;  %v986_v61 = vmax.f32 %v2478_v54, 0.0 }
 0x1a9   : > { %v987_v60 = vmax.f32 %v2479_v56, 0.0  ;;  %2335 = vmatprep.subr.bf16.mxu1 %v2675_v15 }
 0x1aa   : > { %v988_v62 = vmax.f32 %v2480_v58, 0.0 }
 0x1ab   : > { %v997_v63 = vpack.c.bf16 %v987_v60, %v985_v59 }
 0x1ac   : > { %v998_v0 = vpack.c.bf16 %v988_v62, %v986_v61  ;;  %v968_v1 = vpop.f32.mrb[12].mxu0  ;;  %2336 = vmatpush3.bf16.msra.mxu1 %v2675_v15 }
 0x1ad   : > { %v2481_v2 = vadd.f32 %v968_v1, %v520_v19  ;;  %v970_v3 = vpop.f32.mrb[13].mxu0  ;;  %2337 = vmatprep.subr.bf16.mxu1 %v2676_v16 }
 0x1ae   : > { %v2482_v4 = vadd.f32 %v970_v3, %v3206_v20  ;;  %v972_v5 = vpop.f32.mrb[14].mxu0  ;;  %1184 = vmatprep.mubr.bf16.mxu1 %v998_v0  ;;  %v2682_v3 = vld [vmem:[%s3496_s7 + $0x10] sm:$0xff]  }
 0x1af   : > { %v2483_v6 = vadd.f32 %v972_v5, %v520_v19  ;;  %v974_v7 = vpop.f32.mrb[15].mxu0  ;;  %1185 = vmatmul.mubr.bf16.gmra.mrb[8].mxu1 %v997_v63  ;;  %v989_v9 = vmax.f32 %v2481_v2, 0.0  ;;  %v2679_v19 = vld [vmem:[%s3494_s5 + $0x38] sm:$0xff]   ;;  %v2160_v5 = vld [vmem:[%s3495_s6] ss:$0 sm:$0xff] }
 0x1b0   : > { %v2484_v8 = vadd.f32 %v974_v7, %v3206_v20  ;;  %v990_v11 = vmax.f32 %v2482_v4, 0.0  ;;  %2338 = vmatpush3.bf16.msra.mxu1 %v2676_v16  ;;  %v2680_v20 = vld [vmem:[%s3496_s7] sm:$0xff]   ;;  %v2683_v4 = vld [vmem:[%s3496_s7 + $0x18] sm:$0xff]  }
 0x1b1   : > { %v991_v10 = vmax.f32 %v2483_v6, 0.0  ;;  %2339 = vmatprep.subr.bf16.mxu1 %v2677_v17 }
 0x1b2   : > { %v992_v12 = vmax.f32 %v2484_v8, 0.0 }
 0x1b3   : > { %v999_v13 = vpack.c.bf16 %v991_v10, %v989_v9 }
 0x1b4   : > { %v1000_v14 = vpack.c.bf16 %v992_v12, %v990_v11  ;;  %2340 = vmatpush3.bf16.msra.mxu1 %v2677_v17 }
 0x1b5   : > { %2341 = vmatprep.subr.bf16.mxu1 %v2678_v18 }
 0x1b6   : > { %1192 = vmatprep.mubr.bf16.mxu1 %v1000_v14 }
 0x1b7   : > { %1193 = vmatmul.mubr.bf16.gmra.mrb[12].mxu1 %v999_v13 }
 0x1b8   : > { %2342 = vmatpush3.bf16.msra.mxu1 %v2678_v18 }
 0x1b9   : > { %2343 = vmatprep.subr.bf16.mxu1 %v2679_v19 }
 0x1bc   : > { %2344 = vmatpush3.bf16.msra.mxu1 %v2679_v19 }
 0x1bd   : > { %2353 = vmatprep.subr.bf16.mxu1 %v2680_v20 }
 0x272   : > { %v2239_v21 = vpop.f32.mrb[0].mxu1 }
 0x273   : > { %v2240_v23 = vpop.f32.mrb[1].mxu1 }
 0x274   : > { %v2241_v24 = vadd.f32 %v2240_v23, %v2239_v21  ;;  %v2242_v25 = vpop.f32.mrb[2].mxu1 }
 0x275   : > { %v2243_v26 = vpop.f32.mrb[3].mxu1 }
 0x276   : > { %v1171_v27 = vadd.f32 %v2241_v24, %v2143_v22  ;;  %v2244_v28 = vadd.f32 %v2243_v26, %v2242_v25 }
 0x278   : > { %v1174_v29 = vadd.f32 %v2244_v28, %v2143_v22  ;;  %v1201_v30 = vmax.f32 %v1171_v27, 0.0 }
 0x27a   : > { %v1202_v31 = vmax.f32 %v1174_v29, 0.0  ;;  %v2245_v32 = vpop.f32.mrb[4].mxu1 }
 0x27b   : > { %v2246_v33 = vpop.f32.mrb[5].mxu1 }
 0x27c   : > { %v2247_v34 = vadd.f32 %v2246_v33, %v2245_v32  ;;  %v2248_v35 = vpop.f32.mrb[6].mxu1  ;;  %v1209_v36 = vpack.c.bf16 %v1202_v31, %v1201_v30 }
 0x27d   : > { %v2249_v37 = vpop.f32.mrb[7].mxu1 }
 0x27e   : > { %v1179_v38 = vadd.f32 %v2247_v34, %v2143_v22  ;;  %v2250_v39 = vadd.f32 %v2249_v37, %v2248_v35  ;;  %2345 = vmatprep.mubr.bf16.mxu1 %v1209_v36  ;;  %v2684_v34 = vld [vmem:[%s3498_s9] sm:$0xff]   ;;  %v2685_v35 = vld [vmem:[%s3498_s9 + $0x8] sm:$0xff]  }
 0x27f   : > { %v2169_v36 = vld [vmem:[%s3497_s8] ss:$0 sm:$0xff] }
 0x280   : > { %v1182_v40 = vadd.f32 %v2250_v39, %v2143_v22  ;;  %v1203_v41 = vmax.f32 %v1179_v38, 0.0 }
 0x282   : > { %v1204_v42 = vmax.f32 %v1182_v40, 0.0  ;;  %v2251_v43 = vpop.f32.mrb[8].mxu1 }
 0x283   : > { %v2252_v44 = vpop.f32.mrb[9].mxu1 }
 0x284   : > { %v1210_v45 = vpack.c.bf16 %v1204_v42, %v1203_v41  ;;  %v2253_v46 = vadd.f32 %v2252_v44, %v2251_v43  ;;  %v2254_v47 = vpop.f32.mrb[10].mxu1 }
 0x285   : > { %v2255_v49 = vpop.f32.mrb[11].mxu1 }
 0x286   : > { %v1187_v50 = vadd.f32 %v2253_v46, %v2143_v22  ;;  %v2256_v51 = vadd.f32 %v2255_v49, %v2254_v47  ;;  %2346 = vmatmul.mubr.bf16.vlgmr.msra.gmra.mrb[16].mxu1 %v1210_v45 }
 0x287   : > { %2354 = vmatpush3.bf16.msra.mxu1 %v2680_v20 }
 0x288   : > { %v1190_v52 = vadd.f32 %v2256_v51, %v2143_v22  ;;  %2355 = vmatprep.subr.bf16.mxu1 %v2681_v48  ;;  %v1205_v53 = vmax.f32 %v1187_v50, 0.0 }
 0x28a   : > { %v1206_v54 = vmax.f32 %v1190_v52, 0.0  ;;  %v2257_v55 = vpop.f32.mrb[12].mxu1 }
 0x28b   : > { %v2258_v56 = vpop.f32.mrb[13].mxu1  ;;  %2356 = vmatpush3.bf16.msra.mxu1 %v2681_v48 }
 0x28c   : > { %v2259_v57 = vadd.f32 %v2258_v56, %v2257_v55  ;;  %v2260_v58 = vpop.f32.mrb[14].mxu1  ;;  %v1211_v59 = vpack.c.bf16 %v1206_v54, %v1205_v53  ;;  %2357 = vmatprep.subr.bf16.mxu1 %v2682_v3 }
 0x28d   : > { %v2261_v60 = vpop.f32.mrb[15].mxu1 }
 0x28e   : > { %v1195_v61 = vadd.f32 %v2259_v57, %v2143_v22  ;;  %v2262_v62 = vadd.f32 %v2261_v60, %v2260_v58  ;;  %2349 = vmatprep.mubr.bf16.mxu1 %v1211_v59 }
 0x28f   : > { %2358 = vmatpush3.bf16.msra.mxu1 %v2682_v3 }
 0x290   : > { %v1198_v63 = vadd.f32 %v2262_v62, %v2143_v22  ;;  %v1207_v0 = vmax.f32 %v1195_v61, 0.0  ;;  %2359 = vmatprep.subr.bf16.mxu1 %v2683_v4 }
 0x292   : > { %v1208_v1 = vmax.f32 %v1198_v63, 0.0 }
 0x293   : > { %2360 = vmatpush3.bf16.msra.mxu1 %v2683_v4  ;;  %v2178_v4 = vld [vmem:[%s3528_s26] ss:$0 sm:$0xff]  ;;  %s2823_s26 = smov [#allocation7]  }
 0x294   : > { %v1212_v2 = vpack.c.bf16 %v1208_v1, %v1207_v0  ;;  %2369 = vmatprep.subr.bf16.mxu1 %v2684_v34  ;;  %v1603_v1 = vld [vmem:[%s3500_s11 + $0x60] sm:$0xff]  ;;  %s2748_s27 = sshll.u32 %s2823_s26, 4  ;;  %s2749_s27 = int_to_ptr.vmem [resolvable:$false] %s2748_s27 }
 0x295   : > { %s2750_s12 = scalar_lea.vmem %s2749_s27, 8192  ;;  %p2751_p10 = scmp.lt.s32.totalorder %s3443_s14, %s2749_s27 }
 0x296   : > { %2350 = vmatmul.mubr.bf16.gmra.mrb[20].mxu1 %v1212_v2  ;;  %v1591_v2 = vld [vmem:[%s3500_s11] sm:$0xff]  ;;  %p2752_p13 = scmp.lt.s32.totalorder %s2750_s12, %s2744_s25 }
 0x297   : > { %2397 = vmatprep.mubr.msk.f32.mxu0 %vm1400_vm0, %v1591_v2 }
 0x298   : > { %p2753_p3 = por %p2752_p13, %p2751_p10 }
 0x29a   : > { %p2754_p7 = pnand %p2753_p3, %p2747_p8 }
 0x359   : > { %v2347_v6 = vpop.f32.mrb[16].mxu1 }
 0x35a   : > { %v1327_v7 = vadd.f32 %v2347_v6, %v2160_v5  ;;  %v1318_v8 = vpop.f32.mrb[17].mxu1 }
 0x35b   : > { %v1319_v9 = vadd.f32 %v2160_v5, %v1318_v8  ;;  %v2348_v10 = vpop.f32.mrb[18].mxu1 }
 0x35c   : > { %v1330_v11 = vadd.f32 %v2348_v10, %v2160_v5  ;;  %v1321_v12 = vpop.f32.mrb[19].mxu1  ;;  %v1351_v14 = vmax.f32 %v1327_v7, 0.0 }
 0x35d   : > { %v1322_v13 = vadd.f32 %v2160_v5, %v1321_v12  ;;  %v1349_v16 = vmax.f32 %v1319_v9, 0.0 }
 0x35e   : > { %v1352_v15 = vmax.f32 %v1330_v11, 0.0 }
 0x35f   : > { %v1350_v17 = vmax.f32 %v1322_v13, 0.0 }
 0x360   : > { %v1358_v18 = vpack.c.bf16 %v1352_v15, %v1351_v14 }
 0x361   : > { %v1357_v19 = vpack.c.bf16 %v1350_v17, %v1349_v16 }
 0x363   : > { %2361 = vmatprep.mubr.msk.bf16.mxu1 %vm1400_vm0, %v1357_v19 }
 0x364   : > { %2362 = vmatmul.mubr.msk.bf16.vlgmr.msra.gmra.mrb[24].mxu1 %vm1400_vm0, %v1358_v18 }
 0x365   : > { %2370 = vmatpush3.bf16.msra.mxu1 %v2684_v34  ;;  %v1609_v34 = vld [vmem:[%s3500_s11 + $0x90] sm:$0xff] }
 0x366   : > { %2371 = vmatprep.subr.bf16.mxu1 %v2685_v35 }
 0x369   : > { %v2351_v20 = vpop.f32.mrb[20].mxu1  ;;  %2372 = vmatpush3.bf16.msra.mxu1 %v2685_v35  ;;  %v1597_v35 = vld [vmem:[%s3500_s11 + $0x30] sm:$0xff] }
 0x36a   : > { %v1343_v21 = vadd.f32 %v2351_v20, %v2160_v5  ;;  %v1334_v22 = vpop.f32.mrb[21].mxu1 }
 0x36b   : > { %v1335_v23 = vadd.f32 %v2160_v5, %v1334_v22  ;;  %v2352_v24 = vpop.f32.mrb[22].mxu1 }
 0x36c   : > { %v1346_v25 = vadd.f32 %v2352_v24, %v2160_v5  ;;  %v1337_v26 = vpop.f32.mrb[23].mxu1  ;;  %v1355_v28 = vmax.f32 %v1343_v21, 0.0  ;;  %v1604_v24 = vld [vmem:[%s3500_s11 + $0x68] sm:$0xff] }
 0x36d   : > { %v1338_v27 = vadd.f32 %v2160_v5, %v1337_v26  ;;  %v1353_v30 = vmax.f32 %v1335_v23, 0.0  ;;  %v1605_v26 = vld [vmem:[%s3500_s11 + $0x70] sm:$0xff] }
 0x36e   : > { %v1356_v29 = vmax.f32 %v1346_v25, 0.0  ;;  %v1592_v25 = vld [vmem:[%s3500_s11 + $0x8] sm:$0xff] }
 0x36f   : > { %v1354_v31 = vmax.f32 %v1338_v27, 0.0  ;;  %v1593_v27 = vld [vmem:[%s3500_s11 + $0x10] sm:$0xff] }
 0x370   : > { %v1360_v32 = vpack.c.bf16 %v1356_v29, %v1355_v28  ;;  %v1606_v28 = vld [vmem:[%s3500_s11 + $0x78] sm:$0xff] }
 0x371   : > { %v1359_v33 = vpack.c.bf16 %v1354_v31, %v1353_v30  ;;  %v1594_v29 = vld [vmem:[%s3500_s11 + $0x18] sm:$0xff]  ;;  %v1607_v30 = vld [vmem:[%s3500_s11 + $0x80] sm:$0xff] }
 0x372   : > { %v1595_v31 = vld [vmem:[%s3500_s11 + $0x20] sm:$0xff] }
 0x373   : > { %2365 = vmatprep.mubr.msk.bf16.mxu1 %vm1400_vm0, %v1359_v33  ;;  %v1596_v33 = vld [vmem:[%s3500_s11 + $0x28] sm:$0xff] }
 0x374   : > { %2366 = vmatmul.mubr.msk.bf16.gmra.mrb[28].mxu1 %vm1400_vm0, %v1360_v32  ;;  %v1608_v32 = vld [vmem:[%s3500_s11 + $0x88] sm:$0xff] }
 0x437   : > { %v2363_v37 = vpop.f32.mrb[24].mxu1 }
 0x438   : > { %v1456_v38 = vadd.f32 %v2363_v37, %v2169_v36  ;;  %v1447_v39 = vpop.f32.mrb[25].mxu1  ;;  %v1598_v37 = vld [vmem:[%s3500_s11 + $0x38] sm:$0xff] }
 0x439   : > { %v1448_v40 = vadd.f32 %v2169_v36, %v1447_v39  ;;  %v2364_v41 = vpop.f32.mrb[26].mxu1  ;;  %v1599_v39 = vld [vmem:[%s3500_s11 + $0x40] sm:$0xff] }
 0x43a   : > { %v1459_v42 = vadd.f32 %v2364_v41, %v2169_v36  ;;  %v1450_v43 = vpop.f32.mrb[27].mxu1  ;;  %v1480_v45 = vmax.f32 %v1456_v38, 0.0  ;;  %v1611_v38 = vld [vmem:[%s3500_s11 + $0xa0] sm:$0xff]  ;;  %v1600_v41 = vld [vmem:[%s3500_s11 + $0x48] sm:$0xff] }
 0x43b   : > { %v1451_v44 = vadd.f32 %v2169_v36, %v1450_v43  ;;  %v1478_v47 = vmax.f32 %v1448_v40, 0.0  ;;  %v1612_v40 = vld [vmem:[%s3500_s11 + $0xa8] sm:$0xff]  ;;  %v1601_v43 = vld [vmem:[%s3500_s11 + $0x50] sm:$0xff] }
 0x43c   : > { %v1481_v46 = vmax.f32 %v1459_v42, 0.0  ;;  %v1613_v42 = vld [vmem:[%s3500_s11 + $0xb0] sm:$0xff] }
 0x43d   : > { %v1479_v48 = vmax.f32 %v1451_v44, 0.0  ;;  %v1614_v44 = vld [vmem:[%s3500_s11 + $0xb8] sm:$0xff] }
 0x43e   : > { %v1487_v49 = vpack.c.bf16 %v1481_v46, %v1480_v45  ;;  %v1602_v45 = vld [vmem:[%s3500_s11 + $0x58] sm:$0xff]  ;;  %v1615_v46 = vld [vmem:[%s3500_s11 + $0xc0] sm:$0xff] }
 0x43f   : > { %v1486_v50 = vpack.c.bf16 %v1479_v48, %v1478_v47  ;;  %v1616_v47 = vld [vmem:[%s3500_s11 + $0xc8] sm:$0xff]  ;;  %v1617_v48 = vld [vmem:[%s3500_s11 + $0xd0] sm:$0xff] }
 0x441   : > { %2373 = vmatprep.mubr.msk.bf16.mxu1 %vm1513_vm1, %v1486_v50  ;;  %v1619_v50 = vld [vmem:[%s3500_s11 + $0xe0] sm:$0xff] }
 0x442   : > { %2374 = vmatmul.mubr.msk.bf16.vlgmr.msra.gmra.mrb[32].mxu1 %vm1513_vm1, %v1487_v49  ;;  %v1618_v49 = vld [vmem:[%s3500_s11 + $0xd8] sm:$0xff] }
 0x447   : > { %v2367_v51 = vpop.f32.mrb[28].mxu1 }
 0x448   : > { %v1472_v52 = vadd.f32 %v2367_v51, %v2169_v36  ;;  %v1463_v53 = vpop.f32.mrb[29].mxu1  ;;  %v1620_v51 = vld [vmem:[%s3500_s11 + $0xe8] sm:$0xff] }
 0x449   : > { %v1464_v54 = vadd.f32 %v2169_v36, %v1463_v53  ;;  %v2368_v55 = vpop.f32.mrb[30].mxu1  ;;  %v1622_v53 = vld [vmem:[%s3500_s11 + $0xf8] sm:$0xff] }
 0x44a   : > { %v1475_v56 = vadd.f32 %v2368_v55, %v2169_v36  ;;  %v1466_v57 = vpop.f32.mrb[31].mxu1  ;;  %v1484_v59 = vmax.f32 %v1472_v52, 0.0  ;;  %v1621_v52 = vld [vmem:[%s3500_s11 + $0xf0] sm:$0xff] }
 0x44b   : > { %v1467_v58 = vadd.f32 %v2169_v36, %v1466_v57  ;;  %v1482_v61 = vmax.f32 %v1464_v54, 0.0  ;;  %v1610_v36 = vld [vmem:[%s3500_s11 + $0x98] sm:$0xff] }
 0x44c   : > { %v1485_v60 = vmax.f32 %v1475_v56, 0.0 }
 0x44d   : > { %v1483_v62 = vmax.f32 %v1467_v58, 0.0 }
 0x44e   : > { %v1489_v63 = vpack.c.bf16 %v1485_v60, %v1484_v59 }
 0x44f   : > { %v1488_v0 = vpack.c.bf16 %v1483_v62, %v1482_v61 }
 0x451   : > { %2377 = vmatprep.mubr.msk.bf16.mxu1 %vm1513_vm1, %v1488_v0 }
 0x452   : > { %2378 = vmatmul.mubr.msk.bf16.gmra.mrb[36].mxu1 %vm1513_vm1, %v1489_v63 }
 0x453   : > { %2415 = vmatprep.mubr.msk.f32.mxu1 %vm1400_vm0, %v1603_v1 }
 0x515   : > { %v2375_v3 = vpop.f32.mrb[32].mxu1 }
 0x516   : > { %v1560_v5 = vpop.f32.mrb[33].mxu1  ;;  %v1569_v7 = vadd.f32 %v2375_v3, %v2178_v4 }
 0x517   : > { %v2376_v6 = vpop.f32.mrb[34].mxu1  ;;  %v1561_v10 = vadd.f32 %v2178_v4, %v1560_v5 }
 0x518   : > { %v1572_v8 = vadd.f32 %v2376_v6, %v2178_v4  ;;  %v1563_v9 = vpop.f32.mrb[35].mxu1 }
 0x519   : > { %v1564_v11 = vadd.f32 %v2178_v4, %v1563_v9 }
 0x51a   : > { %v2449_v12 = vpack.c.bf16 %v1572_v8, %v1569_v7 }
 0x51b   : > { %v2445_v13 = vpack.c.bf16 %v1564_v11, %v1561_v10 }
 0x51d   : > { %2446 = vmatprep.subr.bf16.mxu0 %v2445_v13  ;;  %2461 = vmatprep.subr.bf16.mxu1 %v2445_v13 }
 0x51e   : > { %2448 = vmatpush3.bf16.msra.mxu0 %v2445_v13  ;;  %2465 = vmatpush3.bf16.msra.mxu1 %v2445_v13 }
 0x51f   : > { %2450 = vmatprep.subr.bf16.mxu0 %v2449_v12  ;;  %2462 = vmatprep.subr.bf16.mxu1 %v2449_v12 }
 0x522   : > { %2452 = vmatpush3.bf16.msra.mxu0 %v2449_v12  ;;  %2466 = vmatpush3.bf16.msra.mxu1 %v2449_v12 }
 0x525   : > { %v2379_v14 = vpop.f32.mrb[36].mxu1 }
 0x526   : > { %v1576_v15 = vpop.f32.mrb[37].mxu1  ;;  %v1585_v17 = vadd.f32 %v2379_v14, %v2178_v4 }
 0x527   : > { %v2380_v16 = vpop.f32.mrb[38].mxu1  ;;  %v1577_v20 = vadd.f32 %v2178_v4, %v1576_v15 }
 0x528   : > { %v1588_v18 = vadd.f32 %v2380_v16, %v2178_v4  ;;  %v1579_v19 = vpop.f32.mrb[39].mxu1 }
 0x529   : > { %v1580_v21 = vadd.f32 %v2178_v4, %v1579_v19 }
 0x52a   : > { %v2457_v22 = vpack.c.bf16 %v1588_v18, %v1585_v17 }
 0x52b   : > { %v2453_v23 = vpack.c.bf16 %v1580_v21, %v1577_v20 }
 0x52d   : > { %2454 = vmatprep.subr.bf16.mxu0 %v2453_v23  ;;  %2463 = vmatprep.subr.bf16.mxu1 %v2453_v23 }
 0x52e   : > { %2456 = vmatpush3.bf16.msra.mxu0 %v2453_v23  ;;  %2467 = vmatpush3.bf16.msra.mxu1 %v2453_v23 }
 0x52f   : > { %2458 = vmatprep.subr.bf16.mxu0 %v2457_v22  ;;  %2464 = vmatprep.subr.bf16.mxu1 %v2457_v22 }
 0x532   : > { %2460 = vmatpush3.bf16.msra.mxu0 %v2457_v22  ;;  %2468 = vmatpush3.bf16.msra.mxu1 %v2457_v22 }
 0x535   : > { %2416 = vmatmul.mubr.msk.f32.vlgmr.msra.gmra.mrb[40].mxu1 %vm1400_vm0, %v1604_v24  ;;  %2398 = vmatmul.mubr.msk.f32.vlgmr.msra.gmra.mrb[16].mxu0 %vm1400_vm0, %v1592_v25 }
 0x536   : > { %2418 = vmatprep.mubr.msk.f32.mxu1 %vm1400_vm0, %v1605_v26  ;;  %2400 = vmatprep.mubr.msk.f32.mxu0 %vm1400_vm0, %v1593_v27 }
 0x539   : > { %2419 = vmatmul.mubr.msk.f32.gmra.mrb[42].mxu1 %vm1400_vm0, %v1606_v28  ;;  %2401 = vmatmul.mubr.msk.f32.gmra.mrb[18].mxu0 %vm1400_vm0, %v1594_v29 }
 0x53a   : > { %2421 = vmatprep.mubr.msk.f32.mxu1 %vm1400_vm0, %v1607_v30  ;;  %2403 = vmatprep.mubr.msk.f32.mxu0 %vm1400_vm0, %v1595_v31 }
 0x53d   : > { %2422 = vmatmul.mubr.msk.f32.gmra.mrb[44].mxu1 %vm1400_vm0, %v1608_v32  ;;  %2404 = vmatmul.mubr.msk.f32.gmra.mrb[20].mxu0 %vm1400_vm0, %v1596_v33 }
 0x53e   : > { %2424 = vmatprep.mubr.msk.f32.mxu1 %vm1400_vm0, %v1609_v34  ;;  %2406 = vmatprep.mubr.msk.f32.mxu0 %vm1400_vm0, %v1597_v35 }
 0x541   : > { %2425 = vmatmul.mubr.msk.f32.gmra.mrb[46].mxu1 %vm1400_vm0, %v1610_v36  ;;  %2407 = vmatmul.mubr.msk.f32.gmra.mrb[22].mxu0 %vm1400_vm0, %v1598_v37 }
 0x542   : > { %2427 = vmatprep.mubr.msk.f32.mxu1 %vm1400_vm0, %v1611_v38  ;;  %2409 = vmatprep.mubr.msk.f32.mxu0 %vm1400_vm0, %v1599_v39 }
 0x545   : > { %2428 = vmatmul.mubr.msk.f32.gmra.mrb[48].mxu1 %vm1400_vm0, %v1612_v40  ;;  %2410 = vmatmul.mubr.msk.f32.gmra.mrb[24].mxu0 %vm1400_vm0, %v1600_v41 }
 0x546   : > { %2430 = vmatprep.mubr.msk.f32.mxu1 %vm1400_vm0, %v1613_v42  ;;  %2412 = vmatprep.mubr.msk.f32.mxu0 %vm1400_vm0, %v1601_v43 }
 0x549   : > { %2431 = vmatmul.mubr.msk.f32.gmra.mrb[50].mxu1 %vm1400_vm0, %v1614_v44  ;;  %2413 = vmatmul.mubr.msk.f32.gmra.mrb[26].mxu0 %vm1400_vm0, %v1602_v45 }
 0x54a   : > { %2433 = vmatprep.mubr.msk.f32.mxu1 %vm1400_vm0, %v1615_v46 }
 0x54d   : > { %2434 = vmatmul.mubr.msk.f32.gmra.mrb[52].mxu1 %vm1400_vm0, %v1616_v47 }
 0x54e   : > { %2436 = vmatprep.mubr.msk.f32.mxu1 %vm1400_vm0, %v1617_v48 }
 0x551   : > { %2437 = vmatmul.mubr.msk.f32.gmra.mrb[54].mxu1 %vm1400_vm0, %v1618_v49 }
 0x552   : > { %2439 = vmatprep.mubr.msk.f32.mxu1 %vm1400_vm0, %v1619_v50 }
 0x555   : > { %2440 = vmatmul.mubr.msk.f32.gmra.mrb[56].mxu1 %vm1400_vm0, %v1620_v51 }
 0x556   : > { %2442 = vmatprep.mubr.msk.f32.mxu1 %vm1400_vm0, %v1621_v52 }
 0x559   : > { %2443 = vmatmul.mubr.msk.f32.gmra.mrb[58].mxu1 %vm1400_vm0, %v1622_v53 }
 0x608   : > { %v2417_v54 = vpop.f32.mrb[40].mxu1  ;;  %v2399_v55 = vpop.f32.mrb[16].mxu0 }
 0x609   : > { %1957 = vst [vmem:[%s3404_s10 + $0x68] sm:$0xff] %v2417_v54  ;;  %v1845_v56 = vpop.f32.mrb[41].mxu1  ;;  %1945 = vst [vmem:[%s3404_s10 + $0x8] sm:$0xff] %v2399_v55  ;;  %v1785_v57 = vpop.f32.mrb[17].mxu0 }
 0x60a   : > { %1956 = vst [vmem:[%s3404_s10 + $0x60] sm:$0xff] %v1845_v56  ;;  %1944 = vst [vmem:[%s3404_s10] sm:$0xff] %v1785_v57 }
 0x60c   : > { %v2420_v58 = vpop.f32.mrb[42].mxu1  ;;  %v2402_v59 = vpop.f32.mrb[18].mxu0 }
 0x60d   : > { %1959 = vst [vmem:[%s3404_s10 + $0x78] sm:$0xff] %v2420_v58  ;;  %v1855_v60 = vpop.f32.mrb[43].mxu1  ;;  %1947 = vst [vmem:[%s3404_s10 + $0x18] sm:$0xff] %v2402_v59  ;;  %v1795_v61 = vpop.f32.mrb[19].mxu0 }
 0x60e   : > { %1958 = vst [vmem:[%s3404_s10 + $0x70] sm:$0xff] %v1855_v60  ;;  %1946 = vst [vmem:[%s3404_s10 + $0x10] sm:$0xff] %v1795_v61 }
 0x610   : > { %v2423_v62 = vpop.f32.mrb[44].mxu1  ;;  %v2405_v63 = vpop.f32.mrb[20].mxu0 }
 0x611   : > { %1961 = vst [vmem:[%s3404_s10 + $0x88] sm:$0xff] %v2423_v62  ;;  %v1865_v0 = vpop.f32.mrb[45].mxu1  ;;  %1949 = vst [vmem:[%s3404_s10 + $0x28] sm:$0xff] %v2405_v63  ;;  %v1805_v1 = vpop.f32.mrb[21].mxu0 }
 0x612   : > { %1960 = vst [vmem:[%s3404_s10 + $0x80] sm:$0xff] %v1865_v0  ;;  %1948 = vst [vmem:[%s3404_s10 + $0x20] sm:$0xff] %v1805_v1 }
 0x614   : > { %v2426_v2 = vpop.f32.mrb[46].mxu1  ;;  %v2408_v3 = vpop.f32.mrb[22].mxu0 }
 0x615   : > { %1963 = vst [vmem:[%s3404_s10 + $0x98] sm:$0xff] %v2426_v2  ;;  %v1875_v4 = vpop.f32.mrb[47].mxu1  ;;  %1951 = vst [vmem:[%s3404_s10 + $0x38] sm:$0xff] %v2408_v3  ;;  %v1815_v5 = vpop.f32.mrb[23].mxu0 }
 0x616   : > { %1962 = vst [vmem:[%s3404_s10 + $0x90] sm:$0xff] %v1875_v4  ;;  %1950 = vst [vmem:[%s3404_s10 + $0x30] sm:$0xff] %v1815_v5 }
 0x618   : > { %v2429_v6 = vpop.f32.mrb[48].mxu1  ;;  %v2411_v7 = vpop.f32.mrb[24].mxu0 }
 0x619   : > { %1965 = vst [vmem:[%s3404_s10 + $0xa8] sm:$0xff] %v2429_v6  ;;  %v1885_v8 = vpop.f32.mrb[49].mxu1  ;;  %1953 = vst [vmem:[%s3404_s10 + $0x48] sm:$0xff] %v2411_v7  ;;  %v1825_v9 = vpop.f32.mrb[25].mxu0 }
 0x61a   : > { %1964 = vst [vmem:[%s3404_s10 + $0xa0] sm:$0xff] %v1885_v8  ;;  %1952 = vst [vmem:[%s3404_s10 + $0x40] sm:$0xff] %v1825_v9 }
 0x61c   : > { %v2432_v10 = vpop.f32.mrb[50].mxu1  ;;  %v2414_v11 = vpop.f32.mrb[26].mxu0 }
 0x61d   : > { %1967 = vst [vmem:[%s3404_s10 + $0xb8] sm:$0xff] %v2432_v10  ;;  %v1895_v12 = vpop.f32.mrb[51].mxu1  ;;  %1955 = vst [vmem:[%s3404_s10 + $0x58] sm:$0xff] %v2414_v11  ;;  %v1835_v13 = vpop.f32.mrb[27].mxu0 }
 0x61e   : > { %1966 = vst [vmem:[%s3404_s10 + $0xb0] sm:$0xff] %v1895_v12  ;;  %1954 = vst [vmem:[%s3404_s10 + $0x50] sm:$0xff] %v1835_v13 }
 0x620   : > { %v2435_v14 = vpop.f32.mrb[52].mxu1 }
 0x621   : > { %1969 = vst [vmem:[%s3404_s10 + $0xc8] sm:$0xff] %v2435_v14  ;;  %v1905_v15 = vpop.f32.mrb[53].mxu1 }
 0x622   : > { %1968 = vst [vmem:[%s3404_s10 + $0xc0] sm:$0xff] %v1905_v15 }
 0x624   : > { %v2438_v16 = vpop.f32.mrb[54].mxu1 }
 0x625   : > { %1971 = vst [vmem:[%s3404_s10 + $0xd8] sm:$0xff] %v2438_v16  ;;  %v1915_v17 = vpop.f32.mrb[55].mxu1 }
 0x626   : > { %1970 = vst [vmem:[%s3404_s10 + $0xd0] sm:$0xff] %v1915_v17 }
 0x628   : > { %v2441_v18 = vpop.f32.mrb[56].mxu1 }
 0x629   : > { %1973 = vst [vmem:[%s3404_s10 + $0xe8] sm:$0xff] %v2441_v18  ;;  %v1925_v19 = vpop.f32.mrb[57].mxu1 }
 0x62a   : > { %1972 = vst [vmem:[%s3404_s10 + $0xe0] sm:$0xff] %v1925_v19 }
 0x62c   : > { %v2444_v20 = vpop.f32.mrb[58].mxu1 }
 0x62d   : > { %1975 = vst [vmem:[%s3404_s10 + $0xf8] sm:$0xff] %v2444_v20  ;;  %v1935_v21 = vpop.f32.mrb[59].mxu1 }
 0x62e   : > { %1974 = vst [vmem:[%s3404_s10 + $0xf0] sm:$0xff] %v1935_v21 }
 0x62f   : > { %2757 = shalt.err (!%p2754_p7)
}
 0x630   : > { %s2758_s16 = scalar_lea.hbm %s3441_s17, 4096  ;;  %s2762_s10 = scalar_lea.hbm %s3529_s13, 8192 }
 0x631   : > { %p2759_p9 = scmp.ne.s32.totalorder %s3441_s17, %s2758_s16  ;;  %p2763_p5 = scmp.lt.u32.totalorder %s3441_s17, %s3529_s13 }
 0x632   : > { %p2764_p11 = scmp.lt.u32.totalorder %s2762_s10, %s2758_s16  ;;  %p2766_p4 = scmp.lt.u32.totalorder %s2758_s16, %s3441_s17 }
 0x633   : > { %p2760_p2 = pnand %p2759_p9, %p2982_p12 }
 0x634   : > { %p2765_p1 = por %p2764_p11, %p2763_p5 }
 0x635   : > { %p2761_p0 = pneg %p2760_p2 }
 0x636   : > { %p2767_p6 = por %p2766_p4, %p2765_p1 }
 0x638   : > { %p2768_p8 = pnand %p2767_p6, %p2761_p0 }
 0x63a   : > { %2771 = shalt.err (!%p2768_p8)
}
 0x63b   : > { %s2824_s28 = smov 128   ;;  %s2825_s25 = smov 8  }
 0x63c   : > { %2510 = dma.vmem_to_hbm [thread:$0]  (%p2982_p12), %s3443_s14, 4096, %s3441_s17, %s1977_s18, %s2824_s28, %s2824_s28, %s2825_s25  }
 0x63d PF: > { %s3530_s26 = sld [smem:[#allocation11_spill]]  ;;  %s3531_s27 = sld [smem:[#allocation12_spill]] }
 0x63e   : > { %p3533_p13 = scmp.ge.s32.totalorder %s2814_s24, 2 }
 0x643   : > { %s2005_s12 = sand.u32 1, %s3530_s26   ;;  %p3532_p10 = scmp.ne.s32.totalorder %s3531_s27, 0 }
 0x644   : > { %s2006_s16 = scalar_lea.sflag [#allocation4], %s2005_s12 }
 0x645   : > { %p2521_p3 = pnand %p3533_p13, %p3532_p10 }
 0x647   : > { %2797 = dma.done.wait (!%p2521_p3), %s2006_s16, 4096  }
 0x648   : > { %2799 = vsyncadd (!%p2521_p3), %s2006_s16, 4294963200  ;;  %s3534_s24 = sld [smem:[#allocation13_spill]]  ;;  %s3535_s21 = smov %s2806_s22 }
 0x649   : > { %s3536_s22 = smov %s2810_s23  ;;  %s3537_s23 = smov %s2978_s15 }
 0x64e   : > { %p26_p7 = scmp.ge.s32.totalorder %s3534_s24, 4  }
 0x650   :  { %28 = sbr.rel (!%p26_p7) target bundleno = 10 (0xa), region = 117 }
 0x657   :  { %2011 = vsyncpa [#allocation3], 1 }
 0x658   :  { %2013 = vsyncpa [#allocation3 + $0x1], 1 }
 0x659   :  { %2014 = vsyncpa [#allocation6], 1 }
 0x65a   :  { %2015 = vsyncpa [#allocation4], 1 }
 0x65b   :  { %2017 = vsyncpa [#allocation4 + $0x1], 1 }

</bundles_post_ra>
